<compile_context>
chip_gen: v5e
topology: v5e:2x2
jax: 0.10.0
libtpu: 0.0.40
codegen_flags: <defaults>
</compile_context>

<pallas_src>
import numpy as np
import jax
import jax.numpy as jnp
from jax import lax
from jax.experimental import pallas as pl
from jax.experimental.pallas import tpu as pltpu

# ---- scaled-down hyper-parameters (original: max_object=100, C=576, final 1152->..->1) ----
MAX_OBJECT = 16          # self.max_object
C_PT = 48                # point-feature channels coming out of `features` (extract_features)
C_BOX = 16               # channels coming out of `box_feature_net`
C_TOTAL = C_PT + C_BOX   # channels seen by stacker2_bn  (576 in the original)
H1 = 64                  # final_net hidden sizes (1x1 convs):  2*C_TOTAL -> H1 -> H2 -> 1
H2 = 32
FALSE_CONSTANT = 10.0    # self.false_constant
BN_EPS = 1e-5


def _make_rep_np():
    """One-hot replication onto the flattened pair grid, column c = i*N + j.

    Row i      (i < N) selects all columns with c // N == i  (pre  replication).
    Row N + j          selects all columns with c %  N == j  (next replication).
    """
    n = MAX_OBJECT
    nn = n * n
    rep = np.zeros((2 * n, nn), np.float32)
    cols = np.arange(nn)
    rep[cols // n, cols] = 1.0
    rep[n + (cols % n), cols] = 1.0
    return rep


_REP = jnp.asarray(_make_rep_np())          # [2N, N*N] constant, DMA'd once per launch


def _sst_pair_kernel(x_ref, rep_ref, wcat_ref, w2_ref, bias_ref, b3_ref, out_ref):
    """Fused stacker2 (pairwise concat, BN pre-folded) + final_net (1x1 convs + ReLU).

    x_ref    : [1, 2C, 2N]  block-diagonal per-pair input [[pre, 0], [0, nxt]]
    rep_ref  : [2N, NN]     constant one-hot replication matrix
    wcat_ref : [H1, 2C]     BN-folded first 1x1 conv, [w1a | w1b]
    w2_ref   : [H2, H1]     second 1x1 conv
    bias_ref : [H1, 3]      col0 = b1, col1 = b2 (zero-padded), col2 = w3^T (zero-padded)
    b3_ref   : [1]          SMEM scalar
    out_ref  : [1, 1, NN]   flattened affinity, column c = i*N + j holds
                            MLP(concat(bn(pre[i]), bn(next[j]))).
    """
    x = x_ref[0]                                                               # [2C, 2N]

    # First 1x1 conv over both frames in a single K=2C matmul: ab = [a_t | b_t].
    ab = jnp.dot(wcat_ref[...], x, preferred_element_type=jnp.float32)         # [H1, 2N]

    # Replicate onto the pair grid and sum a_t[:, i] + b_t[:, j] in one K=2N
    # MXU accumulation (rep = vstack(rep_pre, rep_nxt)).
    h1 = jnp.dot(ab, rep_ref[...], preferred_element_type=jnp.float32)         # [H1, NN]

    # NOTE: nn.Dropout(0.5) is identity at inference time (not applied here).
    # TODO(synk): training-mode dropout / batch-statistics BatchNorm not implemented.
    h1 = jnp.maximum(h1 + bias_ref[:, 0:1], 0.0)                               # [H1, NN]

    h2 = jnp.dot(w2_ref[...], h1, preferred_element_type=jnp.float32)          # [H2, NN]
    h2 = jnp.maximum(h2 + bias_ref[:H2, 1:2], 0.0)                             # [H2, NN]

    # Final 1-channel conv kept off the MXU: VPU broadcast-multiply by w3 and a
    # sublane reduce (XLU), avoiding a stationary-operand load in the epilogue.
    w3 = bias_ref[:H2, 2:3]                                                    # [H2, 1]
    o = jnp.sum(w3 * h2, axis=0, keepdims=True) + b3_ref[0]                    # [1, NN]
    out_ref[0] = jnp.maximum(o, 0.0)                                           # lane-dense


def sst_pair_affinity(x_pairs, prep):
    """x_pairs: [B, 2*C_TOTAL, 2*N] block-diagonal per-pair inputs.

    Returns [B, N, N] affinity maps out[b, i, j] = MLP(concat(bn(pre[i]), bn(next[j]))).
    """
    b_pairs = x_pairs.shape[0]
    n = MAX_OBJECT
    nn = n * n

    def full2d(shape):
        return pl.BlockSpec(shape, lambda b: (0, 0))

    flat = pl.pallas_call(
        _sst_pair_kernel,
        out_shape=jax.ShapeDtypeStruct((b_pairs, 1, nn), jnp.float32),
        grid=(b_pairs,),
        in_specs=[
            pl.BlockSpec((1, 2 * C_TOTAL, 2 * n), lambda b: (b, 0, 0)),   # per-pair input
            full2d((2 * n, nn)),                                          # rep (resident)
            full2d((H1, 2 * C_TOTAL)),                                    # W_cat (resident)
            full2d((H2, H1)),                                             # w2 (resident)
            full2d((H1, 3)),                                              # bias slab (resident)
            pl.BlockSpec(memory_space=pltpu.MemorySpace.SMEM),            # b3 scalar
        ],
        out_specs=pl.BlockSpec((1, 1, nn), lambda b: (b, 0, 0)),
        compiler_params=pltpu.CompilerParams(
            dimension_semantics=("parallel",)),                           # 2x on v7x (2 TCs)
    )(x_pairs, _REP, prep["w_cat"], prep["w2"], prep["bias"], prep["b3"])
    return flat.reshape(b_pairs, n, n)


# ---------------------------------------------------------------------------
# Wrapper-side glue (layout + one-time parameter preparation)
# ---------------------------------------------------------------------------

def _pad_cols(x):
    return jnp.pad(x, ((0, 0), (0, MAX_OBJECT - x.shape[1])))


def _pad_rows(x):
    # nn.ConstantPad2d((0, 0, 0, max_object - n), 0)
    return jnp.pad(x, ((0, MAX_OBJECT - x.shape[0]), (0, 0)))


def build_pair_input(output_features, box_feat_f1, box_feat_f2, det_split0):
    """Build the [2*C_TOTAL, 2*N] block-diagonal kernel input [[pre, 0], [0, nxt]].

    output_features is already channel-first ([1, C_PT, N_total]), so the per-frame
    features are produced directly in [C, N] layout (no transpose before the kernel).
    """
    feats = output_features[0]                                       # [C_PT, N_total]
    pre = jnp.concatenate([_pad_cols(feats[:, :det_split0]),
                           _pad_cols(box_feat_f1.T)], axis=0)        # [C_TOTAL, N]
    nxt = jnp.concatenate([_pad_cols(feats[:, det_split0:]),
                           _pad_cols(box_feat_f2.T)], axis=0)        # [C_TOTAL, N]
    z = jnp.zeros((C_TOTAL, MAX_OBJECT), jnp.float32)
    return jnp.concatenate(
        [jnp.concatenate([pre, z], axis=1),
         jnp.concatenate([z, nxt], axis=1)], axis=0)                 # [2*C_TOTAL, 2*N]


def prepare_params(params):
    """One-time parameter prep: fold eval-mode BatchNorm2d into the first 1x1 conv,
    concat w1a|w1b, and pack the small biases / final weight into one VMEM slab.
    Call once when parameters are loaded (NOT per forward call)."""
    scale = params["bn_gamma"] / jnp.sqrt(params["bn_var"] + BN_EPS)          # [C_TOTAL]
    shift = params["bn_beta"] - params["bn_mean"] * scale                     # [C_TOTAL]
    w_cat = jnp.concatenate([params["w1a"] * scale[None, :],
                             params["w1b"] * scale[None, :]], axis=1)         # [H1, 2C]
    b1_f = (params["b1"][:, 0]
            + jnp.dot(params["w1a"], shift)
            + jnp.dot(params["w1b"], shift))                                  # [H1]
    bias = jnp.zeros((H1, 3), jnp.float32)
    bias = bias.at[:, 0].set(b1_f)
    bias = bias.at[:H2, 1].set(params["b2"][:, 0])
    bias = bias.at[:H2, 2].set(params["w3"][0, :])
    return {"w_cat": w_cat,
            "w2": params["w2"],
            "bias": bias,
            "b3": jnp.reshape(params["b3"], (1,))}


def sst_forward(output_features, box_feat_f1, box_feat_f2, det_split0, prep):
    """SST.forward after the external feature extractors (single frame pair)."""
    x_pair = build_pair_input(output_features, box_feat_f1, box_feat_f2, det_split0)
    aff = sst_pair_affinity(x_pair[None], prep)[0]                            # [N, N]
    # add_unmatched_dim: append a false-constant column and row (single pad op).
    x = jnp.pad(aff, ((0, 1), (0, 1)), constant_values=FALSE_CONSTANT)
    return x[None, None]                                                      # [1, 1, N+1, N+1]


# ---------------------------------------------------------------------------
# Pure-JAX reference (for validation) + parameter init
# ---------------------------------------------------------------------------

def sst_reference(output_features, box_feat_f1, box_feat_f2, det_split0, params):
    feats = jnp.transpose(output_features[0], (1, 0))                 # [N_total, C_PT]
    x_pre = jnp.concatenate([_pad_rows(feats[:det_split0]), _pad_rows(box_feat_f1)], axis=1)
    x_next = jnp.concatenate([_pad_rows(feats[det_split0:]), _pad_rows(box_feat_f2)], axis=1)
    scale = params["bn_gamma"] / jnp.sqrt(params["bn_var"] + BN_EPS)
    shift = params["bn_beta"] - params["bn_mean"] * scale
    p = x_pre * scale + shift                                         # [N, C]
    n = x_next * scale + shift                                        # [N, C]
    pair = jnp.concatenate(
        [jnp.broadcast_to(p[:, None, :], (MAX_OBJECT, MAX_OBJECT, C_TOTAL)),
         jnp.broadcast_to(n[None, :, :], (MAX_OBJECT, MAX_OBJECT, C_TOTAL))], axis=-1)
    w1 = jnp.concatenate([params["w1a"], params["w1b"]], axis=1)      # [H1, 2C]
    h1 = jax.nn.relu(jnp.einsum("ijc,hc->ijh", pair, w1) + params["b1"][:, 0])
    h2 = jax.nn.relu(jnp.einsum("ijh,kh->ijk", h1, params["w2"]) + params["b2"][:, 0])
    o = jax.nn.relu(jnp.einsum("ijk,ok->ijo", h2, params["w3"]) + params["b3"][:, 0])[..., 0]
    x = o[None, None]
    x = jnp.concatenate([x, jnp.full((1, 1, MAX_OBJECT, 1), FALSE_CONSTANT)], axis=3)
    x = jnp.concatenate([x, jnp.full((1, 1, 1, MAX_OBJECT + 1), FALSE_CONSTANT)], axis=2)
    return x


def init_params(key):
    ks = jax.random.split(key, 10)
    params = {
        # stacker2_bn = nn.BatchNorm2d(C_TOTAL) -- eval-mode running stats + affine
        "bn_gamma": jax.random.uniform(ks[0], (C_TOTAL,), jnp.float32, 0.5, 1.5),
        "bn_beta": 0.1 * jax.random.normal(ks[1], (C_TOTAL,), jnp.float32),
        "bn_mean": 0.1 * jax.random.normal(ks[2], (C_TOTAL,), jnp.float32),
        "bn_var": jax.random.uniform(ks[3], (C_TOTAL,), jnp.float32, 0.5, 1.5),
        # final_net: 1x1 Conv2d(2*C_TOTAL->H1)+ReLU, Conv2d(H1->H2)+ReLU, Conv2d(H2->1)+ReLU
        "w1a": 0.05 * jax.random.normal(ks[4], (H1, C_TOTAL), jnp.float32),
        "w1b": 0.05 * jax.random.normal(ks[5], (H1, C_TOTAL), jnp.float32),
        "b1": 0.05 * jax.random.normal(ks[6], (H1, 1), jnp.float32),
        "w2": 0.05 * jax.random.normal(ks[7], (H2, H1), jnp.float32),
        "b2": 0.05 * jax.random.normal(ks[8], (H2, 1), jnp.float32),
        "w3": 0.05 * jax.random.normal(ks[9], (1, H2), jnp.float32),
        "b3": jnp.full((1, 1), 0.01, jnp.float32),
    }
    return params


if __name__ == "__main__":
    key = jax.random.PRNGKey(0)
    k_feat, k_b1, k_b2, k_params = jax.random.split(key, 4)

    # Synthetic outputs of the (externally-defined) feature extractors:
    n_pre, n_next = 5, 7
    n_total = n_pre + n_next
    # output_features = features(det_info['bbox_points_scaled'])  -> [1, C_PT, N_total]
    output_features = jax.random.normal(k_feat, (1, C_PT, n_total), jnp.float32)
    # per-frame box features from box_feature_net, before padding to max_object
    box_feat_f1 = jax.random.normal(k_b1, (n_pre, C_BOX), jnp.float32)
    box_feat_f2 = jax.random.normal(k_b2, (n_next, C_BOX), jnp.float32)

    params = init_params(k_params)
    prep = prepare_params(params)          # one-time fold/pack, not per forward call

    out = sst_forward(output_features, box_feat_f1, box_feat_f2, n_pre, prep)
    out = jax.block_until_ready(out)

    ref = jax.block_until_ready(
        sst_reference(output_features, box_feat_f1, box_feat_f2, n_pre, params))

    assert out.shape == (1, 1, MAX_OBJECT + 1, MAX_OBJECT + 1), out.shape
    np.testing.assert_allclose(np.asarray(out), np.asarray(ref), rtol=1e-3, atol=1e-3)

    print("KERNEL_OK")
</pallas_src>

<mosaic_0001>
module attributes {stable_mosaic.version = 11 : i64} {
  func.func @_sst_pair_kernel(%arg0: i32, %arg1: memref<1x128x32xf32, #tpu.memory_space<vmem>>, %arg2: memref<32x256xf32, #tpu.memory_space<vmem>>, %arg3: memref<64x128xf32, #tpu.memory_space<vmem>>, %arg4: memref<32x64xf32, #tpu.memory_space<vmem>>, %arg5: memref<64x3xf32, #tpu.memory_space<vmem>>, %arg6: memref<1xf32, #tpu.memory_space<smem>>, %arg7: memref<1x1x256xf32, #tpu.memory_space<vmem>>) attributes {dimension_semantics = [#tpu.dimension_semantics<parallel>], iteration_bounds = array<i64: 1>, scalar_prefetch = 0 : i64, scratch_operands = 0 : i64, tpu.core_type = #tpu.core_type<tc>, window_params = [{transform_indices = @transform_0, window_bounds = array<i64: 1, 128, 32>}, {pipeline_mode = #tpu.pipeline_mode<synchronous>, transform_indices = @transform_1, window_bounds = array<i64: 32, 256>}, {pipeline_mode = #tpu.pipeline_mode<synchronous>, transform_indices = @transform_2, window_bounds = array<i64: 64, 128>}, {pipeline_mode = #tpu.pipeline_mode<synchronous>, transform_indices = @transform_3, window_bounds = array<i64: 32, 64>}, {pipeline_mode = #tpu.pipeline_mode<synchronous>, transform_indices = @transform_4, window_bounds = array<i64: 64, 3>}, {transform_indices = @transform_5, window_bounds = array<i64: 1>}, {transform_indices = @transform_6, window_bounds = array<i64: 1, 1, 256>}]} {
    %c0 = arith.constant 0 : index
    %c0_0 = arith.constant 0 : index
    %c0_1 = arith.constant 0 : index
    %0 = vector.load %arg1[%c0, %c0_0, %c0_1] : memref<1x128x32xf32, #tpu.memory_space<vmem>>, vector<1x128x32xf32>
    %1 = vector.shape_cast %0 : vector<1x128x32xf32> to vector<128x32xf32>
    %c0_2 = arith.constant 0 : index
    %c0_3 = arith.constant 0 : index
    %2 = vector.load %arg3[%c0_2, %c0_3] : memref<64x128xf32, #tpu.memory_space<vmem>>, vector<64x128xf32>
    %cst = arith.constant dense<0.000000e+00> : vector<64x32xf32>
    %3 = tpu.matmul %2, %1, %cst {dimension_numbers = #tpu.dot_dimension_numbers<[1], [0], [0], [1], [0, 0, 1, 1], [], []>} : vector<64x128xf32>, vector<128x32xf32>, vector<64x32xf32> -> vector<64x32xf32>
    %c0_4 = arith.constant 0 : index
    %c0_5 = arith.constant 0 : index
    %4 = vector.load %arg2[%c0_4, %c0_5] : memref<32x256xf32, #tpu.memory_space<vmem>>, vector<32x256xf32>
    %cst_6 = arith.constant dense<0.000000e+00> : vector<64x256xf32>
    %5 = tpu.matmul %3, %4, %cst_6 {dimension_numbers = #tpu.dot_dimension_numbers<[1], [0], [0], [1], [0, 0, 1, 1], [], []>} : vector<64x32xf32>, vector<32x256xf32>, vector<64x256xf32> -> vector<64x256xf32>
    %c0_7 = arith.constant 0 : index
    %c0_8 = arith.constant 0 : index
    %6 = vector.load %arg5[%c0_7, %c0_8] : memref<64x3xf32, #tpu.memory_space<vmem>>, vector<64x1xf32>
    %7 = vector.broadcast %6 : vector<64x1xf32> to vector<64x256xf32>
    %8 = arith.addf %5, %7 : vector<64x256xf32>
    %cst_9 = arith.constant 0.000000e+00 : f32
    %9 = vector.broadcast %cst_9 : f32 to vector<64x256xf32>
    %10 = arith.maximumf %8, %9 : vector<64x256xf32>
    %c0_10 = arith.constant 0 : index
    %c0_11 = arith.constant 0 : index
    %11 = vector.load %arg4[%c0_10, %c0_11] : memref<32x64xf32, #tpu.memory_space<vmem>>, vector<32x64xf32>
    %cst_12 = arith.constant dense<0.000000e+00> : vector<32x256xf32>
    %12 = tpu.matmul %11, %10, %cst_12 {dimension_numbers = #tpu.dot_dimension_numbers<[1], [0], [0], [1], [0, 0, 1, 1], [], []>} : vector<32x64xf32>, vector<64x256xf32>, vector<32x256xf32> -> vector<32x256xf32>
    %c0_13 = arith.constant 0 : index
    %c1 = arith.constant 1 : index
    %13 = vector.load %arg5[%c0_13, %c1] : memref<64x3xf32, #tpu.memory_space<vmem>>, vector<32x1xf32>
    %14 = vector.broadcast %13 : vector<32x1xf32> to vector<32x256xf32>
    %15 = arith.addf %12, %14 : vector<32x256xf32>
    %cst_14 = arith.constant 0.000000e+00 : f32
    %16 = vector.broadcast %cst_14 : f32 to vector<32x256xf32>
    %17 = arith.maximumf %15, %16 : vector<32x256xf32>
    %c0_15 = arith.constant 0 : index
    %c2 = arith.constant 2 : index
    %18 = vector.load %arg5[%c0_15, %c2] : memref<64x3xf32, #tpu.memory_space<vmem>>, vector<32x1xf32>
    %19 = vector.broadcast %18 : vector<32x1xf32> to vector<32x256xf32>
    %20 = arith.mulf %19, %17 : vector<32x256xf32>
    %cst_16 = arith.constant dense<0.000000e+00> : vector<256xf32>
    %21 = vector.multi_reduction <add>, %20, %cst_16 [0] : vector<32x256xf32> to vector<256xf32>
    %22 = vector.shape_cast %21 : vector<256xf32> to vector<1x256xf32>
    %c0_17 = arith.constant 0 : index
    %23 = memref.load %arg6[%c0_17] : memref<1xf32, #tpu.memory_space<smem>>
    %24 = vector.broadcast %23 : f32 to vector<1x256xf32>
    %25 = arith.addf %22, %24 : vector<1x256xf32>
    %cst_18 = arith.constant 0.000000e+00 : f32
    %26 = vector.broadcast %cst_18 : f32 to vector<1x256xf32>
    %27 = arith.maximumf %25, %26 : vector<1x256xf32>
    %c0_19 = arith.constant 0 : index
    %c0_20 = arith.constant 0 : index
    %c0_21 = arith.constant 0 : index
    %28 = vector.load %arg7[%c0_19, %c0_20, %c0_21] : memref<1x1x256xf32, #tpu.memory_space<vmem>>, vector<1x1x256xf32>
    %29 = vector.shape_cast %28 : vector<1x1x256xf32> to vector<1x256xf32>
    %30 = vector.shape_cast %27 : vector<1x256xf32> to vector<1x1x256xf32>
    tpu.vector_store %arg7[%c0_19, %c0_20, %c0_21], %30 {strides = array<i32>} : memref<1x1x256xf32, #tpu.memory_space<vmem>>, vector<1x1x256xf32>,
    return
  }
  func.func @transform_0(%arg0: i32) -> (i32, i32, i32) {
    %c0_i32 = arith.constant 0 : i32
    %c0_i32_0 = arith.constant 0 : i32
    %c0_i32_1 = arith.constant 0 : i32
    return %arg0, %c0_i32, %c0_i32_0 : i32, i32, i32
  }
  func.func @transform_1(%arg0: i32) -> (i32, i32) {
    %c0_i32 = arith.constant 0 : i32
    %c0_i32_0 = arith.constant 0 : i32
    %c0_i32_1 = arith.constant 0 : i32
    return %c0_i32, %c0_i32_0 : i32, i32
  }
  func.func @transform_2(%arg0: i32) -> (i32, i32) {
    %c0_i32 = arith.constant 0 : i32
    %c0_i32_0 = arith.constant 0 : i32
    %c0_i32_1 = arith.constant 0 : i32
    return %c0_i32, %c0_i32_0 : i32, i32
  }
  func.func @transform_3(%arg0: i32) -> (i32, i32) {
    %c0_i32 = arith.constant 0 : i32
    %c0_i32_0 = arith.constant 0 : i32
    %c0_i32_1 = arith.constant 0 : i32
    return %c0_i32, %c0_i32_0 : i32, i32
  }
  func.func @transform_4(%arg0: i32) -> (i32, i32) {
    %c0_i32 = arith.constant 0 : i32
    %c0_i32_0 = arith.constant 0 : i32
    %c0_i32_1 = arith.constant 0 : i32
    return %c0_i32, %c0_i32_0 : i32, i32
  }
  func.func @transform_5(%arg0: i32) -> i32 {
    %c0_i32 = arith.constant 0 : i32
    %c0_i32_0 = arith.constant 0 : i32
    return %c0_i32 : i32
  }
  func.func @transform_6(%arg0: i32) -> (i32, i32, i32) {
    %c0_i32 = arith.constant 0 : i32
    %c0_i32_0 = arith.constant 0 : i32
    %c0_i32_1 = arith.constant 0 : i32
    return %arg0, %c0_i32, %c0_i32_0 : i32, i32, i32
  }
}

</mosaic_0001>

<bundles_post_ra>
// kernel: tpu_custom_call.1
= control target key start
LH: loop header
LB: loop body
LE: loop exit
PB: predicated region body
PF: predicated region fallthrough
CT: control target
= control target key end

     0   :  { %s747_s0 = inlined_call_operand.vmem [shape: f32[1,128,32], index: 0, kind: input, shape index: {}]   ;;  %s748_s1 = inlined_call_operand.vmem [shape: f32[32,256], index: 1, kind: input, shape index: {}]   ;;  %s749_s2 = inlined_call_operand.vmem [shape: f32[64,128], index: 2, kind: input, shape index: {}]   ;;  %s750_s3 = inlined_call_operand.vmem [shape: f32[32,64], index: 3, kind: input, shape index: {}]   ;;  %s751_s4 = inlined_call_operand.vmem [shape: f32[64,3], index: 4, kind: input, shape index: {}]   ;;  %s752_s5 = inlined_call_operand.<no memory space> [shape: f32[1], index: 5, kind: input, shape index: {}]   ;;  %s753_s6 = inlined_call_operand.hbm [shape: f32[1,1,256], index: 6, kind: output, shape index: {}]  }
   0x1   :  { %v40_v0 = vld [vmem:[%s747_s0 + $0x78] sm:$0xff]  ;;  %v39_v1 = vld [vmem:[%s747_s0 + $0x70] sm:$0xff]  ;;  %v38_v2 = vld [vmem:[%s747_s0 + $0x68] sm:$0xff] }
   0x2   :  { %49 = vmatpush.msra.mxu0 %v40_v0  ;;  %v37_v3 = vld [vmem:[%s747_s0 + $0x60] sm:$0xff]  ;;  %v36_v4 = vld [vmem:[%s747_s0 + $0x58] sm:$0xff] }
   0x4   :  { %50 = vmatpush.msra.mxu0 %v39_v1 }
   0x6   :  { %51 = vmatpush.msra.mxu0 %v38_v2 }
   0x7   :  { %12 = vsyncpa [#allocation4], 0  ;;  %v35_v5 = vld [vmem:[%s747_s0 + $0x50] sm:$0xff]  ;;  %v34_v6 = vld [vmem:[%s747_s0 + $0x48] sm:$0xff]  ;;  %v514_v25 = vmov 0   ;;  %vm146_vm0 = vcmask 261120  }
   0x8   :  { %52 = vmatpush.msra.mxu0 %v37_v3  ;;  %v33_v7 = vld [vmem:[%s747_s0 + $0x40] sm:$0xff]  ;;  %v32_v8 = vld [vmem:[%s747_s0 + $0x38] sm:$0xff]  ;;  %v31_v9 = vld [vmem:[%s747_s0 + $0x30] sm:$0xff]  ;;  %480 = vset.pattern.permute.xlu1 %v514_v25  ;;  %vm297_vm1 = vcmask 523264   ;;  %s517_s9 = smov [#allocation3]   ;;  %vm427_vm2 = vcmask 1040384  }
   0x9   :  { %v30_v10 = vld [vmem:[%s747_s0 + $0x28] sm:$0xff]  ;;  %v29_v11 = vld [vmem:[%s747_s0 + $0x20] sm:$0xff]  ;;  %v28_v12 = vld [vmem:[%s747_s0 + $0x18] sm:$0xff]  ;;  %479 = vset.pattern.permute.xlu0 %v514_v25  ;;  %481 = vset.pattern.permute.xlu2 %v514_v25  ;;  %s440_s10 = sshll.u32 %s517_s9, 4  ;;  %s441_s10 = int_to_ptr.vmem [resolvable:$true] %s440_s10 }
   0xa   :  { %53 = vmatpush.msra.mxu0 %v36_v4  ;;  %v27_v13 = vld [vmem:[%s747_s0 + $0x10] sm:$0xff]  ;;  %v26_v14 = vld [vmem:[%s747_s0 + $0x8] sm:$0xff]  ;;  %v25_v15 = vld [vmem:[%s747_s0] sm:$0xff]  ;;  %v515_v4 = vmov 1   ;;  %s442_s0 = sshll.u32 %s753_s6, 4  ;;  %s443_s0 = int_to_ptr.hbm [resolvable:$true] %s442_s0 }
   0xb   :  { %v41_v16 = vld [vmem:[%s749_s2] sm:$0xff]  ;;  %v42_v17 = vld [vmem:[%s749_s2 + $0x8] sm:$0xff]  ;;  %v43_v18 = vld [vmem:[%s749_s2 + $0x10] sm:$0xff] }
   0xc   :  { %54 = vmatpush.msra.mxu0 %v35_v5  ;;  %v44_v19 = vld [vmem:[%s749_s2 + $0x18] sm:$0xff]  ;;  %v96_v20 = vld [vmem:[%s748_s1 + $0x30] sm:$0xff]  ;;  %v103_v22 = vld [vmem:[%s751_s4 + $0x28] sm:$0xff] }
   0xd   :  { %v97_v21 = vld [vmem:[%s748_s1 + $0x38] sm:$0xff]  ;;  %183 = vmatpush.msra.mxu1 %v96_v20  ;;  %v94_v23 = vld [vmem:[%s748_s1 + $0x20] sm:$0xff]  ;;  %v95_v24 = vld [vmem:[%s748_s1 + $0x28] sm:$0xff]  ;;  %133 = vperm.xlu1 %480, %v103_v22  }
   0xe   :  { %55 = vmatpush.msra.mxu0 %v34_v6  ;;  %224 = vmatpush.msra.mxu2 %v97_v21  ;;  %v92_v26 = vld [vmem:[%s748_s1 + $0x10] sm:$0xff]  ;;  %v93_v27 = vld [vmem:[%s748_s1 + $0x18] sm:$0xff]  ;;  %v45_v28 = vld [vmem:[%s749_s2 + $0x20] sm:$0xff] }
   0xf   :  { %184 = vmatpush.msra.mxu1 %v94_v23  ;;  %v46_v29 = vld [vmem:[%s749_s2 + $0x28] sm:$0xff]  ;;  %v47_v30 = vld [vmem:[%s749_s2 + $0x30] sm:$0xff]  ;;  %v48_v31 = vld [vmem:[%s749_s2 + $0x38] sm:$0xff] }
  0x10   :  { %56 = vmatpush.msra.mxu0 %v33_v7  ;;  %225 = vmatpush.msra.mxu2 %v95_v24  ;;  %v90_v32 = vld [vmem:[%s748_s1] sm:$0xff]  ;;  %v91_v33 = vld [vmem:[%s748_s1 + $0x8] sm:$0xff]  ;;  %v105_v34 = vld [vmem:[%s751_s4 + $0x38] sm:$0xff] }
  0x11   :  { %185 = vmatpush.msra.mxu1 %v92_v26  ;;  %v102_v35 = vld [vmem:[%s751_s4 + $0x20] sm:$0xff]  ;;  %143 = vperm.xlu0 %479, %v105_v34   ;;  %v104_v36 = vld [vmem:[%s751_s4 + $0x30] sm:$0xff]  ;;  %v670_v38 = vld [vmem:[%s751_s4 + $0x8] sm:$0xff] }
  0x12   :  { %57 = vmatpush.msra.mxu0 %v32_v8  ;;  %226 = vmatpush.msra.mxu2 %v93_v27  ;;  %v664_v37 = vld [vmem:[%s751_s4] sm:$0xff]  ;;  %v680_v41 = vld [vmem:[%s751_s4 + $0x18] sm:$0xff]  ;;  %v688_v43 = vld [vmem:[%s751_s4 + $0x10] sm:$0xff] }
  0x13   :  { %186 = vmatpush.msra.mxu1 %v90_v32  ;;  %123 = vperm.xlu2 %481, %v680_v41  }
  0x14   :  { %58 = vmatpush.msra.mxu0 %v31_v9  ;;  %227 = vmatpush.msra.mxu2 %v91_v33 }
  0x15   :  { %128 = vperm.xlu1 %480, %v102_v35  }
  0x16   :  { %59 = vmatpush.msra.mxu0 %v30_v10 }
  0x18   :  { %60 = vmatpush.msra.mxu0 %v29_v11 }
  0x19   :  { %138 = vperm.xlu0 %479, %v104_v36  }
  0x1a   :  { %61 = vmatpush.msra.mxu0 %v28_v12 }
  0x1b   :  { %118 = vperm.xlu2 %481, %v688_v43  }
  0x1c   :  { %62 = vmatpush.msra.mxu0 %v27_v13 }
  0x1d   :  { %108 = vperm.xlu1 %480, %v664_v37  }
  0x1e   :  { %63 = vmatpush.msra.mxu0 %v26_v14 }
  0x20   :  { %64 = vmatpush.msra.mxu0 %v25_v15 }
  0x21   :  { %65 = vmatmul.f32.vlgmr.msra.gmra.mxu0 %v41_v16  ;;  %113 = vperm.xlu0 %479, %v670_v38  }
  0x23   :  { %482 = vset.pattern.permute.xlu2 %v515_v4 }
  0x24   :  { %279 = vperm.xlu2 %482, %v664_v37  }
  0x25   :  { %484 = vset.pattern.permute.xlu1 %v515_v4 }
  0x26   :  { %289 = vperm.xlu1 %484, %v688_v43  }
  0x29   :  { %68 = vmatmul.f32.gmra.mxu0 %v42_v17  ;;  %483 = vset.pattern.permute.xlu0 %v515_v4 }
  0x2a   :  { %284 = vperm.xlu0 %483, %v670_v38  }
  0x2c   :  { %294 = vperm.xlu2 %482, %v680_v41  }
  0x31   :  { %71 = vmatmul.f32.gmra.mxu0 %v43_v18  ;;  %v516_v18 = vmov 2  }
  0x32   :  { %485 = vset.pattern.permute.xlu1 %v516_v18  ;;  %487 = vset.pattern.permute.xlu0 %v516_v18 }
  0x33   :  { %377 = vperm.xlu1 %485, %v664_v37   ;;  %385 = vperm.xlu0 %487, %v688_v43  }
  0x34   :  { %486 = vset.pattern.permute.xlu2 %v516_v18 }
  0x35   :  { %381 = vperm.xlu2 %486, %v670_v38  }
  0x39   :  { %74 = vmatmul.f32.gmra.mxu0 %v44_v19 }
  0x3b   :  { %389 = vperm.xlu1 %485, %v680_v41  }
  0x41   :  { %77 = vmatmul.f32.gmra.mxu0 %v45_v28 }
  0x49   :  { %80 = vmatmul.f32.gmra.mxu0 %v46_v29  ;;  %v269_v29 = vld [vmem:[%s750_s3] sm:$0xff] }
  0x51   :  { %83 = vmatmul.f32.gmra.mxu0 %v47_v30 }
  0x59   :  { %86 = vmatmul.f32.gmra.mxu0 %v48_v31 }
  0x6d   :  { %v124_v0 = vpop.permute.xlu2 %123 }
  0x75   :  { %v119_v12 = vpop.permute.xlu2 %118 }
  0x7f   :  { %v134_v61 = vpop.permute.xlu1 %133 }
  0x83   :  { %v144_v60 = vpop.permute.xlu0 %143 }
  0x87   :  { %v129_v2 = vpop.permute.xlu1 %128 }
  0x8b   :  { %v139_v1 = vpop.permute.xlu0 %138 }
  0x8f   :  { %v109_v19 = vpop.permute.xlu1 %108 }
  0x93   :  { %v114_v15 = vpop.permute.xlu0 %113 }
  0x9e   :  { %v66_v39 = vpop.f32.mrf.mxu0 }
  0x9f   :  { %451 = vmatmul.msk.f32.vlgmr.msra.gmra.mxu1 %vm146_vm0, %v66_v39  ;;  %459 = vmatmul.msk.f32.vlgmr.msra.gmra.mxu2 %vm146_vm0, %v66_v39  ;;  %v270_v39 = vld [vmem:[%s750_s3 + $0x8] sm:$0xff] }
  0xa6   :  { %v69_v40 = vpop.f32.mrf.mxu0 }
  0xa7   :  { %452 = vmatmul.msk.f32.gmra.mxu1 %vm146_vm0, %v69_v40  ;;  %460 = vmatmul.msk.f32.gmra.mxu2 %vm146_vm0, %v69_v40 }
  0xae   :  { %v72_v42 = vpop.f32.mrf.mxu0 }
  0xaf   :  { %453 = vmatmul.msk.f32.gmra.mxu1 %vm146_vm0, %v72_v42  ;;  %461 = vmatmul.msk.f32.gmra.mxu2 %vm146_vm0, %v72_v42 }
  0xb6   :  { %v75_v44 = vpop.f32.mrf.mxu0 }
  0xb7   :  { %454 = vmatmul.msk.f32.gmra.mxu1 %vm146_vm0, %v75_v44  ;;  %462 = vmatmul.msk.f32.gmra.mxu2 %vm146_vm0, %v75_v44 }
  0xbe   :  { %v78_v45 = vpop.f32.mrf.mxu0 }
  0xbf   :  { %455 = vmatmul.msk.f32.gmra.mxu1 %vm146_vm0, %v78_v45  ;;  %463 = vmatmul.msk.f32.gmra.mxu2 %vm146_vm0, %v78_v45  ;;  %v271_v45 = vld [vmem:[%s750_s3 + $0x10] sm:$0xff] }
  0xc6   :  { %v81_v46 = vpop.f32.mrf.mxu0 }
  0xc7   :  { %456 = vmatmul.msk.f32.gmra.mxu1 %vm146_vm0, %v81_v46  ;;  %464 = vmatmul.msk.f32.gmra.mxu2 %vm146_vm0, %v81_v46  ;;  %v272_v46 = vld [vmem:[%s750_s3 + $0x18] sm:$0xff] }
  0xce   :  { %v84_v47 = vpop.f32.mrf.mxu0 }
  0xcf   :  { %457 = vmatmul.msk.f32.gmra.mxu1 %vm146_vm0, %v84_v47  ;;  %465 = vmatmul.msk.f32.gmra.mxu2 %vm146_vm0, %v84_v47 }
  0xd6   :  { %v87_v48 = vpop.f32.mrf.mxu0 }
  0xd7   :  { %458 = vmatmul.msk.f32.gmra.mxu1 %vm146_vm0, %v87_v48  ;;  %466 = vmatmul.msk.f32.gmra.mxu2 %vm146_vm0, %v87_v48 }
 0x11c   :  { %v188_v49 = vpop.f32.mrf.mxu1 }
 0x11d   :  { %v189_v23 = vadd.f32 %v188_v49, %v109_v19 }
 0x11f   :  { %v253_v27 = vmax.f32 %v189_v23, 0.0 }
 0x122   :  { %v701_v50 = vpop.f32.mrf.mxu2 }
 0x123   :  { %v230_v38 = vadd.f32 %v701_v50, %v109_v19  ;;  %v280_v50 = vpop.permute.xlu2 %279 }
 0x124   :  { %v191_v51 = vpop.f32.mrf.mxu1 }
 0x125   :  { %v192_v20 = vadd.f32 %v191_v51, %v114_v15  ;;  %v254_v44 = vmax.f32 %v230_v38, 0.0  ;;  %v290_v51 = vpop.permute.xlu1 %289 }
 0x127   :  { %v255_v25 = vmax.f32 %v192_v20, 0.0 }
 0x12a   :  { %v703_v52 = vpop.f32.mrf.mxu2 }
 0x12b   :  { %v233_v40 = vadd.f32 %v703_v52, %v114_v15 }
 0x12c   :  { %v194_v53 = vpop.f32.mrf.mxu1 }
 0x12d   :  { %v195_v16 = vadd.f32 %v194_v53, %v119_v12  ;;  %v256_v43 = vmax.f32 %v233_v40, 0.0  ;;  %v295_v53 = vpop.permute.xlu2 %294 }
 0x12f   :  { %v257_v24 = vmax.f32 %v195_v16, 0.0 }
 0x132   :  { %v705_v54 = vpop.f32.mrf.mxu2 }
 0x133   :  { %v236_v36 = vadd.f32 %v705_v54, %v119_v12  ;;  %v285_v54 = vpop.permute.xlu0 %284 }
 0x134   :  { %v197_v55 = vpop.f32.mrf.mxu1 }
 0x135   :  { %v198_v13 = vadd.f32 %v197_v55, %v124_v0  ;;  %v258_v42 = vmax.f32 %v236_v36, 0.0 }
 0x137   :  { %v259_v21 = vmax.f32 %v198_v13, 0.0 }
 0x13a   :  { %v707_v56 = vpop.f32.mrf.mxu2 }
 0x13b   :  { %v239_v34 = vadd.f32 %v707_v56, %v124_v0 }
 0x13c   :  { %v200_v57 = vpop.f32.mrf.mxu1 }
 0x13d   :  { %v201_v10 = vadd.f32 %v200_v57, %v129_v2  ;;  %v260_v41 = vmax.f32 %v239_v34, 0.0  ;;  %v378_v57 = vpop.permute.xlu1 %377 }
 0x13f   :  { %v261_v17 = vmax.f32 %v201_v10, 0.0 }
 0x142   :  { %v241_v58 = vpop.f32.mrf.mxu2 }
 0x143   :  { %v242_v32 = vadd.f32 %v241_v58, %v129_v2 }
 0x144   :  { %v203_v59 = vpop.f32.mrf.mxu1 }
 0x145   :  { %v204_v8 = vadd.f32 %v203_v59, %v134_v61  ;;  %v262_v37 = vmax.f32 %v242_v32, 0.0 }
 0x147   :  { %v263_v14 = vmax.f32 %v204_v8, 0.0 }
 0x14a   :  { %v244_v62 = vpop.f32.mrf.mxu2 }
 0x14b   :  { %v245_v30 = vadd.f32 %v244_v62, %v134_v61  ;;  %v382_v62 = vpop.permute.xlu2 %381 }
 0x14c   :  { %v206_v63 = vpop.f32.mrf.mxu1 }
 0x14d   :  { %v207_v5 = vadd.f32 %v206_v63, %v139_v1  ;;  %v264_v35 = vmax.f32 %v245_v30, 0.0 }
 0x14f   :  { %v265_v11 = vmax.f32 %v207_v5, 0.0  ;;  %v390_v5 = vpop.permute.xlu1 %389 }
 0x152   :  { %v247_v7 = vpop.f32.mrf.mxu2 }
 0x153   :  { %v248_v28 = vadd.f32 %v247_v7, %v139_v1  ;;  %v386_v1 = vpop.permute.xlu0 %385 }
 0x154   :  { %v209_v3 = vpop.f32.mrf.mxu1 }
 0x155   :  { %v210_v6 = vadd.f32 %v209_v3, %v144_v60  ;;  %v266_v33 = vmax.f32 %v248_v28, 0.0 }
 0x157   :  { %v267_v9 = vmax.f32 %v210_v6, 0.0 }
 0x159   :  { %318 = vmatpush.msra.mxu3 %v267_v9 }
 0x15a   :  { %v250_v22 = vpop.f32.mrf.mxu2 }
 0x15b   :  { %319 = vmatpush.msra.mxu3 %v265_v11  ;;  %v251_v26 = vadd.f32 %v250_v22, %v144_v60 }
 0x15d   :  { %320 = vmatpush.msra.mxu3 %v263_v14  ;;  %v268_v31 = vmax.f32 %v251_v26, 0.0 }
 0x15f   :  { %321 = vmatpush.msra.mxu3 %v261_v17 }
 0x161   :  { %322 = vmatpush.msra.mxu3 %v259_v21 }
 0x163   :  { %323 = vmatpush.msra.mxu3 %v257_v24 }
 0x165   :  { %324 = vmatpush.msra.mxu3 %v255_v25 }
 0x167   :  { %325 = vmatpush.msra.mxu3 %v253_v27 }
 0x168   :  { %467 = vmatmul.msk.f32.vlgmr.msra.gmra.mxu3 %vm297_vm1, %v269_v29 }
 0x169   :  { %347 = vmatpush.msrb.mxu3 %v268_v31 }
 0x16b   :  { %348 = vmatpush.msrb.mxu3 %v266_v33 }
 0x16d   :  { %349 = vmatpush.msrb.mxu3 %v264_v35 }
 0x16f   :  { %350 = vmatpush.msrb.mxu3 %v262_v37 }
 0x170   :  { %468 = vmatmul.msk.f32.gmra.mxu3 %vm297_vm1, %v270_v39 }
 0x171   :  { %351 = vmatpush.msrb.mxu3 %v260_v41  ;;  %v419_v41 = vstv %s752_s5 }
 0x173   :  { %352 = vmatpush.msrb.mxu3 %v258_v42 }
 0x175   :  { %353 = vmatpush.msrb.mxu3 %v256_v43 }
 0x177   :  { %354 = vmatpush.msrb.mxu3 %v254_v44  ;;  %v430_v44 = vlaneseq }
 0x178   :  { %469 = vmatmul.msk.f32.gmra.mxu3 %vm297_vm1, %v271_v45 }
 0x179   :  { %vm432_vm3 = vcmp.lt.s32.totalorder %v430_v44, 256 }
 0x180   :  { %470 = vmatmul.msk.f32.gmra.mxu3 %vm297_vm1, %v272_v46 }
 0x188   :  { %471 = vmatmul.msk.f32.vlgmr.msrb.gmra.mxu3 %vm297_vm1, %v269_v29 }
 0x190   :  { %472 = vmatmul.msk.f32.gmra.mxu3 %vm297_vm1, %v270_v39 }
 0x198   :  { %473 = vmatmul.msk.f32.gmra.mxu3 %vm297_vm1, %v271_v45 }
 0x1a0   :  { %474 = vmatmul.msk.f32.gmra.mxu3 %vm297_vm1, %v272_v46 }
 0x1eb   :  { %v327_v47 = vpop.f32.mrf.mxu3 }
 0x1ec   :  { %v328_v58 = vadd.f32 %v327_v47, %v280_v50 }
 0x1ee   :  { %v368_v63 = vmax.f32 %v328_v58, 0.0 }
 0x1f0   :  { %v392_v6 = vmul.f32 %v378_v57, %v368_v63 }
 0x1f3   :  { %v330_v48 = vpop.f32.mrf.mxu3 }
 0x1f4   :  { %v331_v56 = vadd.f32 %v330_v48, %v285_v54 }
 0x1f6   :  { %v370_v60 = vmax.f32 %v331_v56, 0.0 }
 0x1f8   :  { %v394_v3 = vmul.f32 %v382_v62, %v370_v60 }
 0x1fa   :  { %v400_v8 = vadd.f32 %v394_v3, %v392_v6 }
 0x1fb   :  { %v333_v49 = vpop.f32.mrf.mxu3 }
 0x1fc   :  { %v334_v59 = vadd.f32 %v333_v49, %v290_v51 }
 0x1fe   :  { %v372_v0 = vmax.f32 %v334_v59, 0.0 }
 0x200   :  { %v396_v7 = vmul.f32 %v386_v1, %v372_v0 }
 0x202   :  { %v401_v10 = vadd.f32 %v400_v8, %v396_v7 }
 0x203   :  { %v336_v52 = vpop.f32.mrf.mxu3 }
 0x204   :  { %v337_v61 = vadd.f32 %v336_v52, %v295_v53 }
 0x206   :  { %v374_v4 = vmax.f32 %v337_v61, 0.0 }
 0x208   :  { %v398_v9 = vmul.f32 %v390_v5, %v374_v4 }
 0x20a   :  { %v402_v13 = vadd.f32 %v401_v10, %v398_v9 }
 0x20b   :  { %v356_v55 = vpop.f32.mrf.mxu3 }
 0x20c   :  { %v357_v14 = vadd.f32 %v356_v55, %v280_v50  ;;  %v403_v17 = vrot.slane %v402_v13, 4 }
 0x20e   :  { %v369_v18 = vmax.f32 %v357_v14, 0.0  ;;  %v404_v22 = vadd.f32 %v403_v17, %v402_v13 }
 0x210   :  { %v393_v23 = vmul.f32 %v378_v57, %v369_v18  ;;  %v405_v28 = vrot.slane %v404_v22, 2 }
 0x212   :  { %v406_v32 = vadd.f32 %v405_v28, %v404_v22 }
 0x213   :  { %v359_v2 = vpop.f32.mrf.mxu3 }
 0x214   :  { %v360_v11 = vadd.f32 %v359_v2, %v285_v54  ;;  %v407_v35 = vrot.slane %v406_v32, 1 }
 0x216   :  { %v371_v16 = vmax.f32 %v360_v11, 0.0  ;;  %v408_v39 = vadd.f32 %v407_v35, %v406_v32 }
 0x218   :  { %v395_v20 = vmul.f32 %v382_v62, %v371_v16  ;;  %v420_v42 = vadd.f32 %v419_v41, %v408_v39 }
 0x21a   :  { %v409_v26 = vadd.f32 %v395_v20, %v393_v23  ;;  %v422_v46 = vmax.f32 %v420_v42, 0.0 }
 0x21b   :  { %v362_v12 = vpop.f32.mrf.mxu3 }
 0x21c   :  { %v363_v15 = vadd.f32 %v362_v12, %v290_v51 }
 0x21e   :  { %v373_v19 = vmax.f32 %v363_v15, 0.0 }
 0x220   :  { %v397_v24 = vmul.f32 %v386_v1, %v373_v19 }
 0x222   :  { %v410_v29 = vadd.f32 %v409_v26, %v397_v24 }
 0x223   :  { %v365_v21 = vpop.f32.mrf.mxu3 }
 0x224   :  { %v366_v25 = vadd.f32 %v365_v21, %v295_v53 }
 0x226   :  { %v375_v27 = vmax.f32 %v366_v25, 0.0 }
 0x228   :  { %v399_v30 = vmul.f32 %v390_v5, %v375_v27 }
 0x22a   :  { %v411_v31 = vadd.f32 %v410_v29, %v399_v30 }
 0x22c   :  { %v412_v33 = vrot.slane %v411_v31, 4 }
 0x22e   :  { %v413_v34 = vadd.f32 %v412_v33, %v411_v31 }
 0x230   :  { %v414_v36 = vrot.slane %v413_v34, 2 }
 0x232   :  { %v415_v37 = vadd.f32 %v414_v36, %v413_v34 }
 0x234   :  { %v416_v40 = vrot.slane %v415_v37, 1 }
 0x236   :  { %v417_v38 = vadd.f32 %v416_v40, %v415_v37 }
 0x238   :  { %v421_v43 = vadd.f32 %v419_v41, %v417_v38 }
 0x23a   :  { %v423_v45 = vmax.f32 %v421_v43, 0.0 }
 0x23c   :  { %v426_v47 = vrot.slane %v423_v45, 7 }
 0x23e   :  { %v428_v48 = vsel %vm427_vm2, %v422_v46, %v426_v47 }
 0x23f   :  { %434 = vst.msk [vmem:[#allocation3] sm:$0x3] %vm432_vm3, %v428_v48 }
 0x240   :  { %445 = dma.vmem_to_hbm [thread:$0]  %s441_s10, 32, %s443_s0, [#allocation4]  }
 0x241   :  { %512 = dma.done.wait [#allocation4], 32  }
 0x242   :  { %513 = vsyncadd [#allocation4], 4294967264 }
 0x243   :  { %450 = vsyncpa [#allocation4], 1 }

</bundles_post_ra>
